<compile_context>
chip_gen: v6e
topology: v6e:2x2x1
jax: 0.10.0
libtpu: 0.0.40
codegen_flags: <defaults>
</compile_context>

<pallas_src>
import functools

import jax
import jax.numpy as jnp
from jax import lax
from jax.experimental import pallas as pl
from jax.experimental.pallas import tpu as pltpu

LANE = 128
MAX_TILE_P = 512


def _round_up(x, m):
    return ((x + m - 1) // m) * m


def _avg_patch_kernel(x_ref, o_ref, *, inv_p):
    """Accumulates the spatial mean of x over P tiles into the resident (N, E) output."""
    @pl.when(pl.program_id(0) == 0)
    def _():
        o_ref[...] = jnp.zeros_like(o_ref)

    o_ref[...] += jnp.sum(x_ref[...], axis=-1) * inv_p


def _pooler_kernel(x_ref, t_ref, w_ref, b_ref, attn_ref, pw_ref, acc_ref,
                   *, p_true, tile_p):
    # x_ref : (N, E, TP) patch tile (spatial axis padded with zeros past p_true)
    # t_ref : (N, E)     selected target embedding (resident across the grid)
    # w_ref : (TP, E)    1x1-conv weight tile (padded rows are zero)
    # b_ref : (1, TP)    1x1-conv bias tile   (padded lanes are zero)
    # attn_ref : (N, E)  normalized attention-weighted embedding (resident accumulator out)
    # pw_ref   : (N, TP) |pool weights| tile
    # acc_ref  : (N, E)  f32 accumulator scratch
    j = pl.program_id(0)

    @pl.when(j == 0)
    def _():
        acc_ref[...] = jnp.zeros_like(acc_ref)

    x = x_ref[...]                                               # (N, E, TP)

    # Mask for padded lanes (only non-trivial in the last tile).
    lane = lax.broadcasted_iota(jnp.int32, (1, tile_p), 1) + j * tile_p
    pad = (lane >= p_true).astype(jnp.float32)                   # 1.0 on padded lanes
    keep = 1.0 - pad

    # Batch-mean embedding, L2-normalized over channels per spatial position.
    avg_emb = jnp.mean(x, axis=0)                                # (E, TP)
    emb_sq = jnp.sum(avg_emb * avg_emb, axis=0, keepdims=True)   # (1, TP)
    avg_emb = avg_emb * lax.rsqrt(emb_sq + pad)                  # padded lanes stay 0

    centered = x - avg_emb[None, :, :]                           # (N, E, TP)
    c_sq = jnp.sum(centered * centered, axis=1)                  # (N, TP)

    # 1x1-conv pooling weights: (N, E) x (TP, E) contracted on E -> (N, TP).
    pw = lax.dot_general(t_ref[...], w_ref[...],
                         dimension_numbers=(((1,), (1,)), ((), ())),
                         preferred_element_type=jnp.float32) + b_ref[...]
    pw_ref[...] = jnp.abs(pw)

    # Fold the channel normalization of `centered` into the (N, TP) pooling weights.
    pw_scaled = pw * (lax.rsqrt(c_sq + pad) * keep)              # padded lanes -> 0

    acc_ref[...] += jnp.sum(pw_scaled[:, None, :] * centered, axis=-1)   # (N, E)

    @pl.when(j == pl.num_programs(0) - 1)
    def _():
        a = acc_ref[...]
        a_sq = jnp.sum(a * a, axis=1, keepdims=True)             # (N, 1)
        attn_ref[...] = a * lax.rsqrt(a_sq)


def attention_pooler(projected_patches, target_embedding, conv_w, conv_b):
    """projected_patches: (N, E, p1, p2) f32; target_embedding: (N, E) f32 or None;
    conv_w: (P, E) f32 (Conv2d weight squeezed); conv_b: (P,) f32.
    Returns (attn (N, E), poolweights_abs (N, E, p1, p2)), matching the PyTorch module."""
    N, E, p1, p2 = projected_patches.shape
    P = p1 * p2
    assert conv_w.shape == (P, E)
    assert conv_b.shape == (P,)

    # Pad the spatial axis to full 128-lane vregs and pick a P tile (<= 512 lanes).
    P_pad = _round_up(P, LANE)
    if P_pad <= MAX_TILE_P:
        TP = P_pad
    else:
        TP = MAX_TILE_P
        P_pad = _round_up(P_pad, TP)
    n_tiles = P_pad // TP

    x = projected_patches.reshape(N, E, P).astype(jnp.float32)
    x = jnp.pad(x, ((0, 0), (0, 0), (0, P_pad - P)))
    w = jnp.pad(conv_w.astype(jnp.float32), ((0, P_pad - P), (0, 0)))       # (P_pad, E)
    b = jnp.pad(conv_b.astype(jnp.float32), (0, P_pad - P)).reshape(1, P_pad)

    cparams = pltpu.CompilerParams(
        dimension_semantics=("arbitrary",),          # P axis is a reduction for attn
        vmem_limit_bytes=32 * 1024 * 1024,
    )

    if target_embedding is None:
        # targetEmbedding=None path: use the spatial mean of the patches as the target.
        t = pl.pallas_call(
            functools.partial(_avg_patch_kernel, inv_p=1.0 / P),
            out_shape=jax.ShapeDtypeStruct((N, E), jnp.float32),
            grid=(n_tiles,),
            in_specs=[pl.BlockSpec((N, E, TP), lambda j: (0, 0, j))],
            out_specs=pl.BlockSpec((N, E), lambda j: (0, 0)),
            compiler_params=cparams,
        )(x)
    else:
        t = target_embedding.reshape(N, E).astype(jnp.float32)

    # Advisory cost estimate (elementwise-dominated; matmul is negligible).
    flops = 10 * N * E * P_pad
    bytes_accessed = 4 * (N * E * P_pad + P_pad * E + N * E + P_pad + N * P_pad + N * E)
    transcendentals = P_pad + N * P_pad + N

    attn, pw_abs = pl.pallas_call(
        functools.partial(_pooler_kernel, p_true=P, tile_p=TP),
        out_shape=(jax.ShapeDtypeStruct((N, E), jnp.float32),
                   jax.ShapeDtypeStruct((N, P_pad), jnp.float32)),
        grid_spec=pltpu.PrefetchScalarGridSpec(
            num_scalar_prefetch=0,
            grid=(n_tiles,),
            in_specs=[
                pl.BlockSpec((N, E, TP), lambda j: (0, 0, j)),   # x tile
                pl.BlockSpec((N, E), lambda j: (0, 0)),          # t (resident)
                pl.BlockSpec((TP, E), lambda j: (j, 0)),         # conv weight tile
                pl.BlockSpec((1, TP), lambda j: (0, j)),         # conv bias tile
            ],
            out_specs=(
                pl.BlockSpec((N, E), lambda j: (0, 0)),          # attn (accumulator)
                pl.BlockSpec((N, TP), lambda j: (0, j)),         # |pool weights| tile
            ),
            scratch_shapes=[pltpu.VMEM((N, E), jnp.float32)],
        ),
        compiler_params=cparams,
        cost_estimate=pl.CostEstimate(flops=flops,
                                      transcendentals=transcendentals,
                                      bytes_accessed=bytes_accessed),
    )(x, t, w, b)

    # poolweights.abs() in PyTorch is the (N, 1, p1, p2) weights repeated over E.
    pw_abs = pw_abs[:, :P]
    pw_abs_full = jnp.broadcast_to(pw_abs[:, None, :], (N, E, P)).reshape(N, E, p1, p2)
    return attn, pw_abs_full


def _reference(x, t, w, b):
    """Plain-JAX reference mirroring the PyTorch forward (for sanity checking)."""
    N, E, p1, p2 = x.shape
    avg_patch = x.mean(axis=(2, 3))
    avg_emb = x.mean(axis=0, keepdims=True)
    avg_emb = avg_emb / jnp.linalg.norm(avg_emb, axis=1, keepdims=True)
    xp = x - avg_emb
    xp = xp / jnp.linalg.norm(xp, axis=1, keepdims=True)
    tt = avg_patch if t is None else t
    pw = tt @ w.T + b                                          # (N, P)
    pw_full = jnp.broadcast_to(pw.reshape(N, 1, p1, p2), (N, E, p1, p2))
    attn = jnp.sum(pw_full * xp, axis=(2, 3))
    attn = attn / jnp.linalg.norm(attn, axis=1, keepdims=True)
    return attn, jnp.abs(pw_full)


if __name__ == "__main__":
    N, E, p1, p2 = 2, 32, 8, 8          # joint_featsize=32, patch_size=64
    P = p1 * p2

    key = jax.random.PRNGKey(0)
    k_x, k_t, k_w, k_b = jax.random.split(key, 4)
    x = jax.random.normal(k_x, (N, E, p1, p2), jnp.float32)
    target = jax.random.normal(k_t, (N, E), jnp.float32)
    # deterministic "init" for the 1x1 conv of patch_weighting: Conv2d(E, P, 1)
    conv_w = 0.1 * jax.random.normal(k_w, (P, E), jnp.float32)
    conv_b = 0.01 * jax.random.normal(k_b, (P,), jnp.float32)

    # targetEmbedding provided
    attn, pw_abs = attention_pooler(x, target, conv_w, conv_b)
    jax.block_until_ready((attn, pw_abs))
    ref_attn, ref_pw = _reference(x, target, conv_w, conv_b)
    assert jnp.allclose(attn, ref_attn, atol=1e-4, rtol=1e-4)
    assert jnp.allclose(pw_abs, ref_pw, atol=1e-4, rtol=1e-4)

    # targetEmbedding = None path (uses spatial-mean of the patches)
    attn2, pw_abs2 = attention_pooler(x, None, conv_w, conv_b)
    jax.block_until_ready((attn2, pw_abs2))
    ref_attn2, ref_pw2 = _reference(x, None, conv_w, conv_b)
    assert jnp.allclose(attn2, ref_attn2, atol=1e-4, rtol=1e-4)
    assert jnp.allclose(pw_abs2, ref_pw2, atol=1e-4, rtol=1e-4)

    print("KERNEL_OK")
</pallas_src>

<mosaic_0001>
module attributes {stable_mosaic.version = 11 : i64} {
  func.func @_pooler_kernel(%arg0: i32, %arg1: memref<2x32x128xf32, #tpu.memory_space<vmem>>, %arg2: memref<2x32xf32, #tpu.memory_space<vmem>>, %arg3: memref<128x32xf32, #tpu.memory_space<vmem>>, %arg4: memref<1x128xf32, #tpu.memory_space<vmem>>, %arg5: memref<2x32xf32, #tpu.memory_space<vmem>>, %arg6: memref<2x128xf32, #tpu.memory_space<vmem>>, %arg7: memref<2x32xf32, #tpu.memory_space<vmem>>) attributes {dimension_semantics = [#tpu.dimension_semantics<arbitrary>], iteration_bounds = array<i64: 1>, scalar_prefetch = 0 : i64, scratch_operands = 1 : i64, tpu.core_type = #tpu.core_type<tc>, window_params = [{transform_indices = @transform_0, window_bounds = array<i64: 2, 32, 128>}, {pipeline_mode = #tpu.pipeline_mode<synchronous>, transform_indices = @transform_1, window_bounds = array<i64: 2, 32>}, {transform_indices = @transform_2, window_bounds = array<i64: 128, 32>}, {transform_indices = @transform_3, window_bounds = array<i64: 1, 128>}, {pipeline_mode = #tpu.pipeline_mode<synchronous>, transform_indices = @transform_4, window_bounds = array<i64: 2, 32>}, {transform_indices = @transform_5, window_bounds = array<i64: 2, 128>}]} {
    %c0_i32 = arith.constant 0 : i32
    %0 = arith.cmpi eq, %arg0, %c0_i32 : i32
    %1 = arith.extui %0 : i1 to i32
    %c0_i32_0 = arith.constant 0 : i32
    %2 = arith.cmpi ne, %1, %c0_i32_0 : i32
    scf.if %2 {
      %cst_23 = arith.constant 0.000000e+00 : f32
      %53 = vector.broadcast %cst_23 : f32 to vector<2x32xf32>
      %c0_24 = arith.constant 0 : index
      %c0_25 = arith.constant 0 : index
      %54 = vector.load %arg7[%c0_24, %c0_25] : memref<2x32xf32, #tpu.memory_space<vmem>>, vector<2x32xf32>
      tpu.vector_store %arg7[%c0_24, %c0_25], %53 {strides = array<i32>} : memref<2x32xf32, #tpu.memory_space<vmem>>, vector<2x32xf32>,
    } else {
    }
    %c0 = arith.constant 0 : index
    %c0_1 = arith.constant 0 : index
    %c0_2 = arith.constant 0 : index
    %3 = vector.load %arg1[%c0, %c0_1, %c0_2] : memref<2x32x128xf32, #tpu.memory_space<vmem>>, vector<2x32x128xf32>
    %4 = tpu.iota {dimensions = array<i32: 1>} : vector<1x128xi32>
    %c128_i32 = arith.constant 128 : i32
    %5 = arith.muli %arg0, %c128_i32 : i32
    %6 = vector.broadcast %5 : i32 to vector<1x128xi32>
    %7 = arith.addi %4, %6 : vector<1x128xi32>
    %c64_i32 = arith.constant 64 : i32
    %8 = vector.broadcast %c64_i32 : i32 to vector<1x128xi32>
    %9 = arith.cmpi sge, %7, %8 : vector<1x128xi32>
    %10 = arith.extui %9 : vector<1x128xi1> to vector<1x128xi32>
    %11 = arith.sitofp %10 : vector<1x128xi32> to vector<1x128xf32>
    %cst = arith.constant 1.000000e+00 : f32
    %12 = vector.broadcast %cst : f32 to vector<1x128xf32>
    %13 = arith.subf %12, %11 : vector<1x128xf32>
    %cst_3 = arith.constant dense<0.000000e+00> : vector<32x128xf32>
    %14 = vector.multi_reduction <add>, %3, %cst_3 [0] : vector<2x32x128xf32> to vector<32x128xf32>
    %cst_4 = arith.constant 2.000000e+00 : f32
    %15 = vector.broadcast %cst_4 : f32 to vector<32x128xf32>
    %16 = arith.divf %14, %15 : vector<32x128xf32>
    %17 = arith.mulf %16, %16 : vector<32x128xf32>
    %cst_5 = arith.constant dense<0.000000e+00> : vector<128xf32>
    %18 = vector.multi_reduction <add>, %17, %cst_5 [0] : vector<32x128xf32> to vector<128xf32>
    %19 = vector.shape_cast %18 : vector<128xf32> to vector<1x128xf32>
    %20 = arith.addf %19, %11 : vector<1x128xf32>
    %21 = math.rsqrt %20 : vector<1x128xf32>
    %22 = vector.broadcast %21 : vector<1x128xf32> to vector<32x128xf32>
    %23 = arith.mulf %16, %22 : vector<32x128xf32>
    %24 = vector.shape_cast %23 : vector<32x128xf32> to vector<1x32x128xf32>
    %25 = vector.broadcast %24 : vector<1x32x128xf32> to vector<2x32x128xf32>
    %26 = arith.subf %3, %25 : vector<2x32x128xf32>
    %27 = arith.mulf %26, %26 : vector<2x32x128xf32>
    %cst_6 = arith.constant dense<0.000000e+00> : vector<2x128xf32>
    %28 = vector.multi_reduction <add>, %27, %cst_6 [1] : vector<2x32x128xf32> to vector<2x128xf32>
    %c0_7 = arith.constant 0 : index
    %c0_8 = arith.constant 0 : index
    %29 = vector.load %arg2[%c0_7, %c0_8] : memref<2x32xf32, #tpu.memory_space<vmem>>, vector<2x32xf32>
    %c0_9 = arith.constant 0 : index
    %c0_10 = arith.constant 0 : index
    %30 = vector.load %arg3[%c0_9, %c0_10] : memref<128x32xf32, #tpu.memory_space<vmem>>, vector<128x32xf32>
    %cst_11 = arith.constant dense<0.000000e+00> : vector<2x128xf32>
    %31 = tpu.matmul %29, %30, %cst_11 {dimension_numbers = #tpu.dot_dimension_numbers<[1], [1], [0], [0], [0, 0, 1, 0], [], []>} : vector<2x32xf32>, vector<128x32xf32>, vector<2x128xf32> -> vector<2x128xf32>
    %c0_12 = arith.constant 0 : index
    %c0_13 = arith.constant 0 : index
    %32 = vector.load %arg4[%c0_12, %c0_13] : memref<1x128xf32, #tpu.memory_space<vmem>>, vector<1x128xf32>
    %33 = vector.broadcast %32 : vector<1x128xf32> to vector<2x128xf32>
    %34 = arith.addf %31, %33 : vector<2x128xf32>
    %35 = math.absf %34 : vector<2x128xf32>
    %c0_14 = arith.constant 0 : index
    %c0_15 = arith.constant 0 : index
    %36 = vector.load %arg6[%c0_14, %c0_15] : memref<2x128xf32, #tpu.memory_space<vmem>>, vector<2x128xf32>
    tpu.vector_store %arg6[%c0_14, %c0_15], %35 {strides = array<i32>} : memref<2x128xf32, #tpu.memory_space<vmem>>, vector<2x128xf32>,
    %37 = vector.broadcast %11 : vector<1x128xf32> to vector<2x128xf32>
    %38 = arith.addf %28, %37 : vector<2x128xf32>
    %39 = math.rsqrt %38 : vector<2x128xf32>
    %40 = vector.broadcast %13 : vector<1x128xf32> to vector<2x128xf32>
    %41 = arith.mulf %39, %40 : vector<2x128xf32>
    %42 = arith.mulf %34, %41 : vector<2x128xf32>
    %c0_16 = arith.constant 0 : index
    %c0_17 = arith.constant 0 : index
    %43 = vector.load %arg7[%c0_16, %c0_17] : memref<2x32xf32, #tpu.memory_space<vmem>>, vector<2x32xf32>
    %44 = vector.shape_cast %42 : vector<2x128xf32> to vector<2x1x128xf32>
    %45 = vector.broadcast %44 : vector<2x1x128xf32> to vector<2x32x128xf32>
    %46 = arith.mulf %45, %26 : vector<2x32x128xf32>
    %cst_18 = arith.constant dense<0.000000e+00> : vector<2x32xf32>
    %47 = vector.multi_reduction <add>, %46, %cst_18 [2] : vector<2x32x128xf32> to vector<2x32xf32>
    %48 = arith.addf %43, %47 : vector<2x32xf32>
    %c0_19 = arith.constant 0 : index
    %c0_20 = arith.constant 0 : index
    %49 = vector.load %arg7[%c0_19, %c0_20] : memref<2x32xf32, #tpu.memory_space<vmem>>, vector<2x32xf32>
    tpu.vector_store %arg7[%c0_19, %c0_20], %48 {strides = array<i32>} : memref<2x32xf32, #tpu.memory_space<vmem>>, vector<2x32xf32>,
    %c0_i32_21 = arith.constant 0 : i32
    %50 = arith.cmpi eq, %arg0, %c0_i32_21 : i32
    %51 = arith.extui %50 : i1 to i32
    %c0_i32_22 = arith.constant 0 : i32
    %52 = arith.cmpi ne, %51, %c0_i32_22 : i32
    scf.if %52 {
      %c0_23 = arith.constant 0 : index
      %c0_24 = arith.constant 0 : index
      %53 = vector.load %arg7[%c0_23, %c0_24] : memref<2x32xf32, #tpu.memory_space<vmem>>, vector<2x32xf32>
      %54 = arith.mulf %53, %53 : vector<2x32xf32>
      %cst_25 = arith.constant dense<0.000000e+00> : vector<2xf32>
      %55 = vector.multi_reduction <add>, %54, %cst_25 [1] : vector<2x32xf32> to vector<2xf32>
      %56 = vector.shape_cast %55 : vector<2xf32> to vector<2x1xf32>
      %57 = math.rsqrt %56 : vector<2x1xf32>
      %58 = vector.broadcast %57 : vector<2x1xf32> to vector<2x32xf32>
      %59 = arith.mulf %53, %58 : vector<2x32xf32>
      %c0_26 = arith.constant 0 : index
      %c0_27 = arith.constant 0 : index
      %60 = vector.load %arg5[%c0_26, %c0_27] : memref<2x32xf32, #tpu.memory_space<vmem>>, vector<2x32xf32>
      tpu.vector_store %arg5[%c0_26, %c0_27], %59 {strides = array<i32>} : memref<2x32xf32, #tpu.memory_space<vmem>>, vector<2x32xf32>,
    } else {
    }
    return
  }
  func.func @transform_0(%arg0: i32) -> (i32, i32, i32) {
    %c0_i32 = arith.constant 0 : i32
    %c0_i32_0 = arith.constant 0 : i32
    %c0_i32_1 = arith.constant 0 : i32
    return %c0_i32, %c0_i32_0, %arg0 : i32, i32, i32
  }
  func.func @transform_1(%arg0: i32) -> (i32, i32) {
    %c0_i32 = arith.constant 0 : i32
    %c0_i32_0 = arith.constant 0 : i32
    %c0_i32_1 = arith.constant 0 : i32
    return %c0_i32, %c0_i32_0 : i32, i32
  }
  func.func @transform_2(%arg0: i32) -> (i32, i32) {
    %c0_i32 = arith.constant 0 : i32
    %c0_i32_0 = arith.constant 0 : i32
    return %arg0, %c0_i32 : i32, i32
  }
  func.func @transform_3(%arg0: i32) -> (i32, i32) {
    %c0_i32 = arith.constant 0 : i32
    %c0_i32_0 = arith.constant 0 : i32
    return %c0_i32, %arg0 : i32, i32
  }
  func.func @transform_4(%arg0: i32) -> (i32, i32) {
    %c0_i32 = arith.constant 0 : i32
    %c0_i32_0 = arith.constant 0 : i32
    %c0_i32_1 = arith.constant 0 : i32
    return %c0_i32, %c0_i32_0 : i32, i32
  }
  func.func @transform_5(%arg0: i32) -> (i32, i32) {
    %c0_i32 = arith.constant 0 : i32
    %c0_i32_0 = arith.constant 0 : i32
    return %c0_i32, %arg0 : i32, i32
  }
}

</mosaic_0001>

<bundles_post_ra>
// kernel: tpu_custom_call.1
= control target key start
LH: loop header
LB: loop body
LE: loop exit
PB: predicated region body
PF: predicated region fallthrough
CT: control target
= control target key end

     0   :  { %11 = vsyncpa [#allocation4], 0  ;;  %vm130_vm0 = vcmask 261120   ;;  %v549_v1 = vmov 0.0   ;;  %vm550_vm1 = vmmov 0   ;;  %s752_s0 = inlined_call_operand.vmem [shape: f32[2,32,128], index: 0, kind: input, shape index: {}]   ;;  %s753_s1 = inlined_call_operand.vmem [shape: f32[2,32], index: 1, kind: input, shape index: {}]   ;;  %s754_s2 = inlined_call_operand.vmem [shape: f32[128,32], index: 2, kind: input, shape index: {}]   ;;  %s755_s3 = inlined_call_operand.vmem [shape: f32[1,128], index: 3, kind: input, shape index: {}]   ;;  %s756_s4 = inlined_call_operand.hbm [shape: f32[2,32], index: 4, kind: output, shape index: {0}]   ;;  %s757_s5 = inlined_call_operand.hbm [shape: f32[2,128], index: 5, kind: output, shape index: {1}]  }
   0x1   :  { %v122_v0 = vld [vmem:[%s754_s2 + $0x78] sm:$0xff]  ;;  %457 = vmatprep.subr.mxu0 %v549_v1  ;;  %489 = vmatprep.mubr.msk.f32.mxu0 %vm550_vm1, %v549_v1  ;;  %v121_v2 = vld [vmem:[%s754_s2 + $0x70] sm:$0xff] }
   0x2   :  { %458 = vmatpush3.xpose.msk.msra.mxu0 %vm130_vm0, %v122_v0 }
   0x3   :  { %459 = vmatprep.subr.mxu0 %v549_v1 }
   0x6   :  { %460 = vmatpush3.xpose.msk.msra.mxu0 %vm130_vm0, %v121_v2 }
   0x7   :  { %12 = vsyncpa [#allocation6], 0  ;;  %461 = vmatprep.subr.mxu0 %v549_v1  ;;  %v120_v3 = vld [vmem:[%s754_s2 + $0x68] sm:$0xff]  ;;  %v119_v4 = vld [vmem:[%s754_s2 + $0x60] sm:$0xff]  ;;  %v35_v44 = vlaneseq  ;;  %vm263_vm3 = vcmask 1041409   ;;  %vm25_vm4 = vcmask 254976  }
   0x8   :  { %v118_v5 = vld [vmem:[%s754_s2 + $0x58] sm:$0xff]  ;;  %v117_v6 = vld [vmem:[%s754_s2 + $0x50] sm:$0xff]  ;;  %v116_v7 = vld [vmem:[%s754_s2 + $0x48] sm:$0xff]  ;;  %26 = vst.msk [vmem:[#allocation2] sm:$0x3] %vm25_vm4, %v549_v1  ;;  %vm342_vm5 = vcmask 130112  }
   0x9   :  { %v115_v8 = vld [vmem:[%s754_s2 + $0x40] sm:$0xff]  ;;  %v114_v9 = vld [vmem:[%s754_s2 + $0x38] sm:$0xff]  ;;  %v113_v10 = vld [vmem:[%s754_s2 + $0x30] sm:$0xff]  ;;  %v693_v46 = vand.u32 127, %v35_v44  ;;  %vm349_vm6 = vcmask 195712   ;;  %vm356_vm7 = vcmask 261312  }
   0xa   :  { %462 = vmatpush3.xpose.msk.msra.mxu0 %vm130_vm0, %v120_v3  ;;  %v112_v11 = vld [vmem:[%s754_s2 + $0x28] sm:$0xff]  ;;  %v111_v12 = vld [vmem:[%s754_s2 + $0x20] sm:$0xff]  ;;  %v110_v13 = vld [vmem:[%s754_s2 + $0x18] sm:$0xff] }
   0xb   :  { %463 = vmatprep.subr.mxu0 %v549_v1  ;;  %v109_v14 = vld [vmem:[%s754_s2 + $0x10] sm:$0xff]  ;;  %v108_v15 = vld [vmem:[%s754_s2 + $0x8] sm:$0xff]  ;;  %v107_v16 = vld [vmem:[%s754_s2] sm:$0xff]  ;;  %vm40_vm2 = vcmp.ge.s32.totalorder %v693_v46, 64 }
   0xc   :  { %v106_v17 = vld [vmem:[%s753_s1] sm:$0x3]  ;;  %v28_v19 = vld [vmem:[%s752_s0 + $0x8] sm:$0xff]  ;;  %v29_v24 = vld [vmem:[%s752_s0 + $0x10] sm:$0xff]  ;;  %v421_v49 = vsel %vm40_vm2, 1.0, %v549_v1 }
   0xd   :  { %v27_v18 = vld [vmem:[%s752_s0] sm:$0xff]  ;;  %v32_v21 = vld [vmem:[%s752_s0 + $0x28] sm:$0xff]  ;;  %v33_v25 = vld [vmem:[%s752_s0 + $0x30] sm:$0xff] }
   0xe   :  { %464 = vmatpush3.xpose.msk.msra.mxu0 %vm130_vm0, %v119_v4  ;;  %v31_v20 = vld [vmem:[%s752_s0 + $0x20] sm:$0xff]  ;;  %v45_v23 = vadd.f32 %v32_v21, %v28_v19  ;;  %v46_v26 = vadd.f32 %v33_v25, %v29_v24  ;;  %v30_v29 = vld [vmem:[%s752_s0 + $0x18] sm:$0xff] }
   0xf   :  { %465 = vmatprep.subr.mxu0 %v549_v1  ;;  %v44_v22 = vadd.f32 %v31_v20, %v27_v18  ;;  %v34_v30 = vld [vmem:[%s752_s0 + $0x38] sm:$0xff] }
  0x10   :  { %v50_v28 = vmul.f32 0.5, %v45_v23  ;;  %v47_v31 = vadd.f32 %v34_v30, %v30_v29  ;;  %v51_v32 = vmul.f32 0.5, %v46_v26 }
  0x11   :  { %v49_v27 = vmul.f32 0.5, %v44_v22 }
  0x12   :  { %466 = vmatpush3.xpose.msk.msra.mxu0 %vm130_vm0, %v118_v5  ;;  %v54_v34 = vmul.f32 %v50_v28, %v50_v28  ;;  %v52_v35 = vmul.f32 0.5, %v47_v31  ;;  %v55_v36 = vmul.f32 %v51_v32, %v51_v32 }
  0x13   :  { %467 = vmatprep.subr.mxu0 %v549_v1  ;;  %v53_v33 = vmul.f32 %v49_v27, %v49_v27 }
  0x14   :  { %v56_v38 = vmul.f32 %v52_v35, %v52_v35 }
  0x15   :  { %v57_v37 = vadd.f32 %v54_v34, %v53_v33  ;;  %v551_v33 = vmov 1966171168  }
  0x16   :  { %468 = vmatpush3.xpose.msk.msra.mxu0 %vm130_vm0, %v117_v6  ;;  %v270_v34 = vunpack.c.l.s4 %v551_v33 }
  0x17   :  { %469 = vmatprep.subr.mxu0 %v549_v1  ;;  %v58_v39 = vadd.f32 %v57_v37, %v55_v36 }
  0x18   :  { %v271_v37 = vunpack.c.0.s8 %v270_v34 }
  0x19   :  { %v59_v40 = vadd.f32 %v58_v39, %v56_v38  ;;  %v273_v38 = vshrl.u32 %v35_v44, 7  ;;  %v422_v39 = vld [vmem:[%s755_s3] ss:$0 sm:$0xff]  ;;  %s552_s3 = smov [#allocation5]  }
  0x1a   :  { %470 = vmatpush3.xpose.msk.msra.mxu0 %vm130_vm0, %v116_v7  ;;  %s409_s17 = sshll.u32 %s552_s3, 4  ;;  %s410_s17 = int_to_ptr.vmem [resolvable:$true] %s409_s17 }
  0x1b   :  { %471 = vmatprep.subr.mxu0 %v549_v1  ;;  %v60_v41 = vrot.slane %v59_v40, 4  ;;  %s505_s18 = scalar_lea.vmem %s410_s17, 32  ;;  %p510_p1 = scmp.lt.s32.totalorder %s410_s17, %s410_s17 }
  0x1c   :  { %p506_p0 = scmp.ne.s32.totalorder %s410_s17, %s505_s18  ;;  %p511_p2 = scmp.lt.s32.totalorder %s505_s18, %s505_s18 }
  0x1d   :  { %v61_v42 = vadd.f32 %v60_v41, %v59_v40 }
  0x1e   :  { %472 = vmatpush3.xpose.msk.msra.mxu0 %vm130_vm0, %v115_v8  ;;  %p512_p3 = por %p511_p2, %p510_p1 }
  0x1f   :  { %473 = vmatprep.subr.mxu0 %v549_v1  ;;  %v62_v43 = vrot.slane %v61_v42, 2 }
  0x20   :  { %p513_p4 = pnand %p512_p3, %p506_p0 }
  0x21   :  { %v63_v45 = vadd.f32 %v62_v43, %v61_v42  ;;  %v274_v43 = vsub.s32 %v271_v37, %v273_v38 }
  0x22   :  { %474 = vmatpush3.xpose.msk.msra.mxu0 %vm130_vm0, %v114_v9 }
  0x23   :  { %475 = vmatprep.subr.mxu0 %v549_v1  ;;  %v64_v47 = vrot.slane %v63_v45, 1 }
  0x25   :  { %v65_v48 = vadd.f32 %v64_v47, %v63_v45 }
  0x26   :  { %476 = vmatpush3.xpose.msk.msra.mxu0 %vm130_vm0, %v113_v10 }
  0x27   :  { %477 = vmatprep.subr.mxu0 %v549_v1  ;;  %v66_v50 = vadd.f32 %v421_v49, %v65_v48 }
  0x29   :  { %497 = vrsqrt.f32 %v66_v50  ;;  %v293_v50 = vsub.s32 0, %v273_v38 }
  0x2a   :  { %478 = vmatpush3.xpose.msk.msra.mxu0 %vm130_vm0, %v112_v11 }
  0x2b   :  { %479 = vmatprep.subr.mxu0 %v549_v1 }
  0x2e   :  { %480 = vmatpush3.xpose.msk.msra.mxu0 %vm130_vm0, %v111_v12 }
  0x2f   :  { %481 = vmatprep.subr.mxu0 %v549_v1 }
  0x32   :  { %482 = vmatpush3.xpose.msk.msra.mxu0 %vm130_vm0, %v110_v13 }
  0x33   :  { %483 = vmatprep.subr.mxu0 %v549_v1 }
  0x36   :  { %484 = vmatpush3.xpose.msk.msra.mxu0 %vm130_vm0, %v109_v14  ;;  %v498_v51 = vpop.eup %497 }
  0x37   :  { %485 = vmatprep.subr.mxu0 %v549_v1  ;;  %v68_v52 = vmul.f32 %v498_v51, %v49_v27  ;;  %v69_v53 = vmul.f32 %v498_v51, %v50_v28  ;;  %v70_v54 = vmul.f32 %v498_v51, %v51_v32  ;;  %v71_v57 = vmul.f32 %v498_v51, %v52_v35 }
  0x39   :  { %v697_v55 = vsub.f32 %v31_v20, %v68_v52  ;;  %v699_v56 = vsub.f32 %v32_v21, %v69_v53  ;;  %v72_v58 = vsub.f32 %v27_v18, %v68_v52  ;;  %v701_v59 = vsub.f32 %v28_v19, %v69_v53 }
  0x3a   :  { %486 = vmatpush3.xpose.msk.msra.mxu0 %vm130_vm0, %v108_v15  ;;  %v703_v60 = vsub.f32 %v33_v25, %v70_v54  ;;  %v709_v63 = vsub.f32 %v29_v24, %v70_v54  ;;  %v711_v0 = vsub.f32 %v34_v30, %v71_v57  ;;  %v717_v6 = vsub.f32 %v30_v29, %v71_v57 }
  0x3b   :  { %487 = vmatprep.subr.mxu0 %v549_v1  ;;  %v84_v61 = vmul.f32 %v697_v55, %v697_v55  ;;  %v85_v62 = vmul.f32 %v699_v56, %v699_v56  ;;  %v80_v2 = vmul.f32 %v72_v58, %v72_v58  ;;  %v81_v3 = vmul.f32 %v701_v59, %v701_v59 }
  0x3c   :  { %v86_v4 = vmul.f32 %v703_v60, %v703_v60  ;;  %v82_v7 = vmul.f32 %v709_v63, %v709_v63  ;;  %v87_v8 = vmul.f32 %v711_v0, %v711_v0  ;;  %v83_v11 = vmul.f32 %v717_v6, %v717_v6 }
  0x3d   :  { %v97_v5 = vadd.f32 %v85_v62, %v84_v61  ;;  %v88_v9 = vadd.f32 %v81_v3, %v80_v2  ;;  %v43_v29 = vsub.f32 1.0, %v421_v49 }
  0x3e   :  { %488 = vmatpush3.xpose.msk.msra.mxu0 %vm130_vm0, %v107_v16 }
  0x3f   :  { %v98_v10 = vadd.f32 %v97_v5, %v86_v4  ;;  %v89_v12 = vadd.f32 %v88_v9, %v82_v7 }
  0x41   :  { %490 = vmatmul.mubr.msk.f32.vlgmr.msra.gmra.mxu0 %vm130_vm0, %v106_v17  ;;  %v99_v13 = vadd.f32 %v98_v10, %v87_v8  ;;  %v90_v14 = vadd.f32 %v89_v12, %v83_v11 }
  0x43   :  { %v100_v15 = vrot.slane %v99_v13, 4  ;;  %v91_v16 = vrot.slane %v90_v14, 4 }
  0x45   :  { %v101_v17 = vadd.f32 %v100_v15, %v99_v13  ;;  %v92_v18 = vadd.f32 %v91_v16, %v90_v14 }
  0x47   :  { %v102_v19 = vrot.slane %v101_v17, 2  ;;  %v93_v20 = vrot.slane %v92_v18, 2 }
  0x49   :  { %v103_v21 = vadd.f32 %v102_v19, %v101_v17  ;;  %v94_v22 = vadd.f32 %v93_v20, %v92_v18 }
  0x4b   :  { %v104_v23 = vrot.slane %v103_v21, 1  ;;  %v95_v24 = vrot.slane %v94_v22, 1 }
  0x4d   :  { %v105_v25 = vadd.f32 %v104_v23, %v103_v21  ;;  %v96_v26 = vadd.f32 %v95_v24, %v94_v22 }
  0x4f   :  { %v255_v27 = vadd.f32 %v421_v49, %v105_v25  ;;  %v254_v28 = vadd.f32 %v421_v49, %v96_v26 }
  0x51   :  { %499 = vrsqrt.f32 %v255_v27 }
  0x52   :  { %501 = vrsqrt.f32 %v254_v28 }
  0x5e   :  { %v500_v30 = vpop.eup %499 }
  0x5f   :  { %v259_v31 = vmul.f32 %v500_v30, %v43_v29  ;;  %v502_v32 = vpop.eup %501 }
  0x60   :  { %v258_v35 = vmul.f32 %v502_v32, %v43_v29 }
  0x61   :  { %v262_v36 = vrot.slane %v259_v31, 7 }
  0x63   :  { %v264_v41 = vsel %vm263_vm3, %v262_v36, %v258_v35 }
 0x101   :  { %v248_v40 = vpop.f32.mrf.mxu0 }
 0x102   :  { %v249_v42 = vadd.f32 %v422_v39, %v248_v40 }
 0x103   :  { %v491_v45 = vpop.f32.mrf.mxu0 }
 0x104   :  { %v266_v47 = vmul.f32 %v264_v41, %v249_v42  ;;  %v252_v48 = vand.u32 2147483647, %v249_v42 }
 0x106   :  { %v275_v49 = vrot.slane %v266_v47, %v274_v43  ;;  %253 = vst [vmem:[#allocation5] sm:$0x3] %v252_v48 }
 0x108   :  { %v283_v51 = vrot.slane %v275_v49, %v274_v43  ;;  %v276_v52 = vcombine.high %v275_v49, %v275_v49 }
 0x10a   :  { %v294_v53 = vrot.slane %v283_v51, %v293_v50  ;;  %v290_v54 = vrot.slane %v276_v52, %v274_v43 }
 0x10c   :  { %v301_v44 = vmul.f32 %v294_v53, %v72_v58  ;;  %v298_v57 = vrot.slane %v290_v54, %v293_v50  ;;  %v302_v62 = vmul.f32 %v294_v53, %v701_v59  ;;  %v303_v3 = vmul.f32 %v294_v53, %v709_v63 }
 0x10d   :  { %v304_v5 = vmul.f32 %v294_v53, %v717_v6  ;;  %v344_v63 = vadd.s32 4294967280, %v693_v46 }
 0x10e   :  { %309 = vadd.xlane.f32.xlu0 %v301_v44  ;;  %v305_v61 = vmul.f32 %v298_v57, %v697_v55  ;;  %v306_v2 = vmul.f32 %v298_v57, %v699_v56  ;;  %v307_v4 = vmul.f32 %v298_v57, %v703_v60  ;;  %v308_v58 = vmul.f32 %v298_v57, %v711_v0 }
 0x10f   :  { %v337_v56 = vadd.s32 4294967288, %v693_v46  ;;  %v351_v60 = vadd.s32 4294967272, %v693_v46  ;;  %v347_v6 = vsub.s32 %v344_v63, %v273_v38  ;;  %v335_v0 = vsub.s32 %v693_v46, %v273_v38  ;;  %v267_v46 = vld [vmem:[#allocation2] sm:$0x3] }
 0x110   :  { %317 = vadd.xlane.f32.xlu1 %v305_v61 }
 0x111   :  { %v340_v9 = vsub.s32 %v337_v56, %v273_v38  ;;  %v354_v11 = vsub.s32 %v351_v60, %v273_v38 }
 0x112   :  { %311 = vadd.xlane.f32.xlu0 %v302_v62 }
 0x114   :  { %319 = vadd.xlane.f32.xlu1 %v306_v2 }
 0x116   :  { %313 = vadd.xlane.f32.xlu0 %v303_v3 }
 0x118   :  { %321 = vadd.xlane.f32.xlu1 %v307_v4 }
 0x11a   :  { %315 = vadd.xlane.f32.xlu0 %v304_v5 }
 0x11c   :  { %323 = vadd.xlane.f32.xlu1 %v308_v58 }
 0x197   :  { %v310_v55 = vpop.xlane.xlu0 %309 }
 0x198   :  { %v336_v17 = vrot.slane %v310_v55, %v335_v0 }
 0x199   :  { %v318_v59 = vpop.xlane.xlu1 %317 }
 0x19a   :  { %v361_v18 = vrot.slane %v318_v59, %v335_v0 }
 0x19b   :  { %v312_v7 = vpop.xlane.xlu0 %311 }
 0x19c   :  { %v341_v13 = vrot.slane %v312_v7, %v340_v9 }
 0x19d   :  { %v320_v8 = vpop.xlane.xlu1 %319 }
 0x19e   :  { %v365_v14 = vrot.slane %v320_v8, %v340_v9  ;;  %v343_v21 = vsel %vm342_vm5, %v341_v13, %v336_v17 }
 0x19f   :  { %v314_v10 = vpop.xlane.xlu0 %313 }
 0x1a0   :  { %v348_v1 = vrot.slane %v314_v10, %v347_v6  ;;  %v366_v22 = vsel %vm342_vm5, %v365_v14, %v361_v18 }
 0x1a1   :  { %v322_v12 = vpop.xlane.xlu1 %321 }
 0x1a2   :  { %v370_v15 = vrot.slane %v322_v12, %v347_v6  ;;  %v350_v24 = vsel %vm349_vm6, %v348_v1, %v343_v21 }
 0x1a3   :  { %v316_v16 = vpop.xlane.xlu0 %315 }
 0x1a4   :  { %v355_v19 = vrot.slane %v316_v16, %v354_v11  ;;  %v371_v25 = vsel %vm349_vm6, %v370_v15, %v366_v22 }
 0x1a5   :  { %v324_v20 = vpop.xlane.xlu1 %323 }
 0x1a6   :  { %v375_v23 = vrot.slane %v324_v20, %v354_v11  ;;  %v357_v26 = vsel %vm356_vm7, %v355_v19, %v350_v24 }
 0x1a8   :  { %v376_v27 = vsel %vm356_vm7, %v375_v23, %v371_v25 }
 0x1a9   :  { %v377_v28 = vsel %vm263_vm3, %v376_v27, %v357_v26 }
 0x1aa   :  { %v379_v29 = vadd.f32 %v377_v28, %v267_v46 }
 0x1ac   :  { %381 = vst.msk [vmem:[#allocation2] sm:$0x3] %vm25_vm4, %v379_v29 }
 0x1b3   :  { %v385_v30 = vld [vmem:[#allocation2] sm:$0x3] }
 0x1b4   :  { %v386_v31 = vmul.f32 %v385_v30, %v385_v30 }
 0x1b6   :  { %v387_v32 = vsel %vm25_vm4, %v386_v31, 0.0 }
 0x1b7   :  { %388 = vadd.xlane.f32.xlu0 %v387_v32 }
 0x1b8   :  { %516 = shalt.err (!%p513_p4)
}
 0x1b9   :  { %412 = dma.vmem_to_hbm [thread:$0]  %s410_s17, 32, %s757_s5, [#allocation6]  }
 0x1ba   :  { %s553_s21 = smov [#allocation3]  }
 0x1bb   :  { %s399_s22 = sshll.u32 %s553_s21, 4  ;;  %s400_s22 = int_to_ptr.vmem [resolvable:$true] %s399_s22 }
 0x1bc   :  { %s525_s23 = scalar_lea.vmem %s400_s22, 32  ;;  %p530_p6 = scmp.lt.s32.totalorder %s400_s22, %s400_s22 }
 0x1bd   :  { %p526_p5 = scmp.ne.s32.totalorder %s400_s22, %s525_s23  ;;  %p531_p7 = scmp.lt.s32.totalorder %s525_s23, %s525_s23 }
 0x1bf   :  { %p532_p8 = por %p531_p7, %p530_p6 }
 0x1c1   :  { %p533_p9 = pnand %p532_p8, %p526_p5 }
 0x240   :  { %v389_v33 = vpop.xlane.xlu0 %388 }
 0x241   :  { %503 = vrsqrt.f32 %v389_v33 }
 0x24e   :  { %v504_v34 = vpop.eup %503 }
 0x24f   :  { %v391_v35 = vmul.f32 %v504_v34, %v385_v30 }
 0x251   :  { %392 = vst.msk [vmem:[#allocation3] sm:$0x3] %vm25_vm4, %v391_v35 }
 0x252   :  { %536 = shalt.err (!%p533_p9)
}
 0x253   :  { %402 = dma.vmem_to_hbm [thread:$0]  %s400_s22, 32, %s756_s4, [#allocation4]  }
 0x254   :  { %545 = dma.done.wait [#allocation4], 32  }
 0x255   :  { %546 = vsyncadd [#allocation4], 4294967264 }
 0x256   :  { %547 = dma.done.wait [#allocation6], 32  }
 0x257   :  { %548 = vsyncadd [#allocation6], 4294967264 }
 0x258   :  { %419 = vsyncpa [#allocation4], 1 }
 0x259   :  { %420 = vsyncpa [#allocation6], 1 }

</bundles_post_ra>
